<compile_context>
chip_gen: v7x
topology: tpu7x:2x2x1
jax: 0.10.0
libtpu: 0.0.40
codegen_flags: <defaults>
</compile_context>

<pallas_src>
import jax
import jax.numpy as jnp
from jax.experimental import pallas as pl
from jax.experimental.pallas import tpu as pltpu

HIDDEN_DIMS = [512, 256, 128]   # matches the PyTorch module
H_LANES = 128                   # packed-output lane width


def _round_up(n, m):
    return ((n + m - 1) // m) * m


# ----------------------------- Pallas kernel --------------------------------

def encoder_kernel(
    x_ref,           # (TB, K_PAD)     f32   (cast to bf16 in-kernel)
    w1_ref, b1_ref,  # (K_PAD, 512) bf16, (1, 512) f32
    w2_ref, b2_ref,  # (512, 256)  bf16, (1, 256) f32
    w3_ref, b3_ref,  # (256, 128)  bf16, (1, 128) f32
    wh_ref, bh_ref,  # (128, 256)  bf16, (1, 256) f32   fused head
    eps_ref,         # (TB, 128)   f32   (eps only in the z columns)
    out_ref,         # (TB, 128)   f32   packed [logits | mu | log_var | z | pad]
):
    # fc_layers: Linear -> ReLU, three times (bf16 MXU operands, f32 accumulate/tail)
    h = x_ref[...].astype(jnp.bfloat16)
    h = jnp.maximum(
        jnp.dot(h, w1_ref[...], preferred_element_type=jnp.float32) + b1_ref[...], 0.0)
    h = jnp.maximum(
        jnp.dot(h.astype(jnp.bfloat16), w2_ref[...],
                preferred_element_type=jnp.float32) + b2_ref[...], 0.0)
    h = jnp.maximum(
        jnp.dot(h.astype(jnp.bfloat16), w3_ref[...],
                preferred_element_type=jnp.float32) + b3_ref[...], 0.0)

    # Single fused head matmul: K=128, N=256 (lane-dense on the MXU)
    hd = jnp.dot(h.astype(jnp.bfloat16), wh_ref[...],
                 preferred_element_type=jnp.float32) + bh_ref[...]

    val = hd[:, :H_LANES]     # [logits | mu | log_var | mu(dup) | 0...]
    lvz = hd[:, H_LANES:]     # [0 .................. | log_var  | 0...]

    # Lane-dense reparameterization + packed single store.
    # Outside the z columns: lvz == 0 -> exp(0)*eps(=0) == 0, so val passes through.
    out_ref[...] = val + jnp.exp(0.5 * lvz) * eps_ref[...]


# --------------------------- parameter packing -------------------------------

def pack_params(params, input_dim, latent_dim, num_classes):
    """Pad/fuse/cast the raw (in, out) weights once, outside the hot path."""
    NC, LD = num_classes, latent_dim
    assert NC + 3 * LD <= H_LANES, "packed head layout requires nc + 3*latent <= 128"
    k_pad = _round_up(max(input_dim, 1), 128)

    # fc1 with zero-padded K dim
    w1 = jnp.zeros((k_pad, HIDDEN_DIMS[0]), jnp.float32).at[:input_dim].set(params["w1"])

    # fused head weight / bias: (128, 256)
    wh = jnp.zeros((HIDDEN_DIMS[2], 2 * H_LANES), jnp.float32)
    bh = jnp.zeros((1, 2 * H_LANES), jnp.float32)
    wh = wh.at[:, 0:NC].set(params["wc"])
    bh = bh.at[:, 0:NC].set(params["bc"])
    wh = wh.at[:, NC:NC + LD].set(params["wm"])
    bh = bh.at[:, NC:NC + LD].set(params["bm"])
    wh = wh.at[:, NC + LD:NC + 2 * LD].set(params["wv"])
    bh = bh.at[:, NC + LD:NC + 2 * LD].set(params["bv"])
    # mu duplicated at the z columns (first half), log_var at the z columns (second half)
    wh = wh.at[:, NC + 2 * LD:NC + 3 * LD].set(params["wm"])
    bh = bh.at[:, NC + 2 * LD:NC + 3 * LD].set(params["bm"])
    wh = wh.at[:, H_LANES + NC + 2 * LD:H_LANES + NC + 3 * LD].set(params["wv"])
    bh = bh.at[:, H_LANES + NC + 2 * LD:H_LANES + NC + 3 * LD].set(params["bv"])

    return {
        "w1": w1.astype(jnp.bfloat16),            "b1": params["b1"],
        "w2": params["w2"].astype(jnp.bfloat16),  "b2": params["b2"],
        "w3": params["w3"].astype(jnp.bfloat16),  "b3": params["b3"],
        "wh": wh.astype(jnp.bfloat16),            "bh": bh,
    }


# ------------------------------ Python wrapper -------------------------------

def encoder_forward(x, packed, eps, *, latent_dim, num_classes):
    """x: (B, num_param, window_size) f32; eps: (B, latent_dim) f32.
    Returns (z, mu, log_var, class_logits)."""
    B = x.shape[0]
    NC, LD = num_classes, latent_dim
    x_flat = x.reshape(B, -1).astype(jnp.float32)   # matches torch x.reshape(B, -1)
    in_dim = x_flat.shape[1]
    k_pad = packed["w1"].shape[0]

    # Batch tiling (multiple of 16 keeps every dtype's sublane tiling happy).
    TB = min(256, _round_up(B, 16))
    Bp = _round_up(B, TB)
    grid = (Bp // TB,)

    x_pad = jnp.zeros((Bp, k_pad), jnp.float32).at[:B, :in_dim].set(x_flat)
    # epsilon slab: eps only in the z columns of the packed output, zero elsewhere
    eps_slab = jnp.zeros((Bp, H_LANES), jnp.float32)
    eps_slab = eps_slab.at[:B, NC + 2 * LD:NC + 3 * LD].set(eps)

    def full_spec(a):  # weights/biases: VMEM-resident across all grid steps
        return pl.BlockSpec(a.shape, lambda i: (0, 0))

    row_spec = lambda lanes: pl.BlockSpec((TB, lanes), lambda i: (i, 0))

    packed_out = pl.pallas_call(
        encoder_kernel,
        out_shape=jax.ShapeDtypeStruct((Bp, H_LANES), jnp.float32),
        grid=grid,
        in_specs=[
            row_spec(k_pad),
            full_spec(packed["w1"]), full_spec(packed["b1"]),
            full_spec(packed["w2"]), full_spec(packed["b2"]),
            full_spec(packed["w3"]), full_spec(packed["b3"]),
            full_spec(packed["wh"]), full_spec(packed["bh"]),
            row_spec(H_LANES),
        ],
        out_specs=row_spec(H_LANES),
        compiler_params=pltpu.CompilerParams(
            dimension_semantics=("parallel",)),   # v7x: shard batch across both TCs
    )(x_pad,
      packed["w1"], packed["b1"],
      packed["w2"], packed["b2"],
      packed["w3"], packed["b3"],
      packed["wh"], packed["bh"],
      eps_slab)

    out = packed_out[:B]
    logits = out[:, 0:NC]
    mu = out[:, NC:NC + LD]
    log_var = out[:, NC + LD:NC + 2 * LD]
    z = out[:, NC + 2 * LD:NC + 3 * LD]
    return z, mu, log_var, logits


# --------------------------- deterministic params ----------------------------

def init_linear(key, fan_in, fan_out):
    """PyTorch nn.Linear-style uniform init, stored as (in, out) for x @ W."""
    kw, kb = jax.random.split(key)
    bound = 1.0 / jnp.sqrt(float(fan_in))
    w = jax.random.uniform(kw, (fan_in, fan_out), jnp.float32, -bound, bound)
    b = jax.random.uniform(kb, (1, fan_out), jnp.float32, -bound, bound)
    return w, b


def make_params(key, input_dim, latent_dim, num_classes):
    keys = jax.random.split(key, 6)
    p = {}
    p["w1"], p["b1"] = init_linear(keys[0], input_dim, HIDDEN_DIMS[0])
    p["w2"], p["b2"] = init_linear(keys[1], HIDDEN_DIMS[0], HIDDEN_DIMS[1])
    p["w3"], p["b3"] = init_linear(keys[2], HIDDEN_DIMS[1], HIDDEN_DIMS[2])
    p["wc"], p["bc"] = init_linear(keys[3], HIDDEN_DIMS[2], num_classes)
    p["wm"], p["bm"] = init_linear(keys[4], HIDDEN_DIMS[2], latent_dim)
    p["wv"], p["bv"] = init_linear(keys[5], HIDDEN_DIMS[2], latent_dim)
    return p


# ---------------------------------- main -------------------------------------

if __name__ == "__main__":
    B, num_param, window_size = 8, 4, 16
    latent_dim, num_classes = 8, 2
    input_dim = num_param * window_size

    root = jax.random.PRNGKey(0)
    k_x, k_p, k_eps = jax.random.split(root, 3)

    x = jax.random.normal(k_x, (B, num_param, window_size), jnp.float32)
    params = make_params(k_p, input_dim, latent_dim, num_classes)
    # epsilon for the reparameterization trick (torch.randn_like(mu)),
    # generated host-side for determinism.
    eps = jax.random.normal(k_eps, (B, latent_dim), jnp.float32)

    packed = pack_params(params, input_dim, latent_dim, num_classes)
    z, mu, log_var, logits = encoder_forward(
        x, packed, eps, latent_dim=latent_dim, num_classes=num_classes)
    jax.block_until_ready((z, mu, log_var, logits))

    # Pure-JAX reference with the same bf16-operand / f32-accumulate recipe.
    def lin(h, w, b):
        return jnp.dot(h.astype(jnp.bfloat16), w.astype(jnp.bfloat16),
                       preferred_element_type=jnp.float32) + b

    h = x.reshape(B, -1)
    h = jnp.maximum(lin(h, params["w1"], params["b1"]), 0.0)
    h = jnp.maximum(lin(h, params["w2"], params["b2"]), 0.0)
    h = jnp.maximum(lin(h, params["w3"], params["b3"]), 0.0)
    rlg = lin(h, params["wc"], params["bc"])
    rmu = lin(h, params["wm"], params["bm"])
    rlv = lin(h, params["wv"], params["bv"])
    rz = rmu + jnp.exp(0.5 * rlv) * eps

    assert jnp.allclose(logits, rlg, atol=2e-2, rtol=2e-2)
    assert jnp.allclose(mu, rmu, atol=2e-2, rtol=2e-2)
    assert jnp.allclose(log_var, rlv, atol=2e-2, rtol=2e-2)
    assert jnp.allclose(z, rz, atol=2e-2, rtol=2e-2)

    print("KERNEL_OK")
</pallas_src>

<mosaic_0001>
module attributes {stable_mosaic.version = 11 : i64} {
  func.func @encoder_kernel(%arg0: i32, %arg1: memref<16x128xf32, #tpu.memory_space<vmem>>, %arg2: memref<128x512xbf16, #tpu.memory_space<vmem>>, %arg3: memref<1x512xf32, #tpu.memory_space<vmem>>, %arg4: memref<512x256xbf16, #tpu.memory_space<vmem>>, %arg5: memref<1x256xf32, #tpu.memory_space<vmem>>, %arg6: memref<256x128xbf16, #tpu.memory_space<vmem>>, %arg7: memref<1x128xf32, #tpu.memory_space<vmem>>, %arg8: memref<128x256xbf16, #tpu.memory_space<vmem>>, %arg9: memref<1x256xf32, #tpu.memory_space<vmem>>, %arg10: memref<16x128xf32, #tpu.memory_space<vmem>>, %arg11: memref<16x128xf32, #tpu.memory_space<vmem>>) attributes {dimension_semantics = [#tpu.dimension_semantics<parallel>], iteration_bounds = array<i64: 1>, scalar_prefetch = 0 : i64, scratch_operands = 0 : i64, tpu.core_type = #tpu.core_type<tc>, window_params = [{transform_indices = @transform_0, window_bounds = array<i64: 16, 128>}, {pipeline_mode = #tpu.pipeline_mode<synchronous>, transform_indices = @transform_1, window_bounds = array<i64: 128, 512>}, {pipeline_mode = #tpu.pipeline_mode<synchronous>, transform_indices = @transform_2, window_bounds = array<i64: 1, 512>}, {pipeline_mode = #tpu.pipeline_mode<synchronous>, transform_indices = @transform_3, window_bounds = array<i64: 512, 256>}, {pipeline_mode = #tpu.pipeline_mode<synchronous>, transform_indices = @transform_4, window_bounds = array<i64: 1, 256>}, {pipeline_mode = #tpu.pipeline_mode<synchronous>, transform_indices = @transform_5, window_bounds = array<i64: 256, 128>}, {pipeline_mode = #tpu.pipeline_mode<synchronous>, transform_indices = @transform_6, window_bounds = array<i64: 1, 128>}, {pipeline_mode = #tpu.pipeline_mode<synchronous>, transform_indices = @transform_7, window_bounds = array<i64: 128, 256>}, {pipeline_mode = #tpu.pipeline_mode<synchronous>, transform_indices = @transform_8, window_bounds = array<i64: 1, 256>}, {transform_indices = @transform_9, window_bounds = array<i64: 16, 128>}, {transform_indices = @transform_10, window_bounds = array<i64: 16, 128>}]} {
    %c0 = arith.constant 0 : index
    %c0_0 = arith.constant 0 : index
    %0 = vector.load %arg1[%c0, %c0_0] : memref<16x128xf32, #tpu.memory_space<vmem>>, vector<16x128xf32>
    %1 = arith.truncf %0 : vector<16x128xf32> to vector<16x128xbf16>
    %c0_1 = arith.constant 0 : index
    %c0_2 = arith.constant 0 : index
    %2 = vector.load %arg2[%c0_1, %c0_2] : memref<128x512xbf16, #tpu.memory_space<vmem>>, vector<128x512xbf16>
    %cst = arith.constant dense<0.000000e+00> : vector<16x512xf32>
    %3 = tpu.matmul %1, %2, %cst {dimension_numbers = #tpu.dot_dimension_numbers<[1], [0], [0], [1], [0, 0, 1, 1], [], []>} : vector<16x128xbf16>, vector<128x512xbf16>, vector<16x512xf32> -> vector<16x512xf32>
    %c0_3 = arith.constant 0 : index
    %c0_4 = arith.constant 0 : index
    %4 = vector.load %arg3[%c0_3, %c0_4] : memref<1x512xf32, #tpu.memory_space<vmem>>, vector<1x512xf32>
    %5 = vector.broadcast %4 : vector<1x512xf32> to vector<16x512xf32>
    %6 = arith.addf %3, %5 : vector<16x512xf32>
    %cst_5 = arith.constant 0.000000e+00 : f32
    %7 = vector.broadcast %cst_5 : f32 to vector<16x512xf32>
    %8 = arith.maximumf %6, %7 : vector<16x512xf32>
    %9 = arith.truncf %8 : vector<16x512xf32> to vector<16x512xbf16>
    %c0_6 = arith.constant 0 : index
    %c0_7 = arith.constant 0 : index
    %10 = vector.load %arg4[%c0_6, %c0_7] : memref<512x256xbf16, #tpu.memory_space<vmem>>, vector<512x256xbf16>
    %cst_8 = arith.constant dense<0.000000e+00> : vector<16x256xf32>
    %11 = tpu.matmul %9, %10, %cst_8 {dimension_numbers = #tpu.dot_dimension_numbers<[1], [0], [0], [1], [0, 0, 1, 1], [], []>} : vector<16x512xbf16>, vector<512x256xbf16>, vector<16x256xf32> -> vector<16x256xf32>
    %c0_9 = arith.constant 0 : index
    %c0_10 = arith.constant 0 : index
    %12 = vector.load %arg5[%c0_9, %c0_10] : memref<1x256xf32, #tpu.memory_space<vmem>>, vector<1x256xf32>
    %13 = vector.broadcast %12 : vector<1x256xf32> to vector<16x256xf32>
    %14 = arith.addf %11, %13 : vector<16x256xf32>
    %cst_11 = arith.constant 0.000000e+00 : f32
    %15 = vector.broadcast %cst_11 : f32 to vector<16x256xf32>
    %16 = arith.maximumf %14, %15 : vector<16x256xf32>
    %17 = arith.truncf %16 : vector<16x256xf32> to vector<16x256xbf16>
    %c0_12 = arith.constant 0 : index
    %c0_13 = arith.constant 0 : index
    %18 = vector.load %arg6[%c0_12, %c0_13] : memref<256x128xbf16, #tpu.memory_space<vmem>>, vector<256x128xbf16>
    %cst_14 = arith.constant dense<0.000000e+00> : vector<16x128xf32>
    %19 = tpu.matmul %17, %18, %cst_14 {dimension_numbers = #tpu.dot_dimension_numbers<[1], [0], [0], [1], [0, 0, 1, 1], [], []>} : vector<16x256xbf16>, vector<256x128xbf16>, vector<16x128xf32> -> vector<16x128xf32>
    %c0_15 = arith.constant 0 : index
    %c0_16 = arith.constant 0 : index
    %20 = vector.load %arg7[%c0_15, %c0_16] : memref<1x128xf32, #tpu.memory_space<vmem>>, vector<1x128xf32>
    %21 = vector.broadcast %20 : vector<1x128xf32> to vector<16x128xf32>
    %22 = arith.addf %19, %21 : vector<16x128xf32>
    %cst_17 = arith.constant 0.000000e+00 : f32
    %23 = vector.broadcast %cst_17 : f32 to vector<16x128xf32>
    %24 = arith.maximumf %22, %23 : vector<16x128xf32>
    %25 = arith.truncf %24 : vector<16x128xf32> to vector<16x128xbf16>
    %c0_18 = arith.constant 0 : index
    %c0_19 = arith.constant 0 : index
    %26 = vector.load %arg8[%c0_18, %c0_19] : memref<128x256xbf16, #tpu.memory_space<vmem>>, vector<128x256xbf16>
    %cst_20 = arith.constant dense<0.000000e+00> : vector<16x256xf32>
    %27 = tpu.matmul %25, %26, %cst_20 {dimension_numbers = #tpu.dot_dimension_numbers<[1], [0], [0], [1], [0, 0, 1, 1], [], []>} : vector<16x128xbf16>, vector<128x256xbf16>, vector<16x256xf32> -> vector<16x256xf32>
    %c0_21 = arith.constant 0 : index
    %c0_22 = arith.constant 0 : index
    %28 = vector.load %arg9[%c0_21, %c0_22] : memref<1x256xf32, #tpu.memory_space<vmem>>, vector<1x256xf32>
    %29 = vector.broadcast %28 : vector<1x256xf32> to vector<16x256xf32>
    %30 = arith.addf %27, %29 : vector<16x256xf32>
    %31 = vector.extract_strided_slice %30 {offsets = [0, 0], sizes = [16, 128], strides = [1, 1]} : vector<16x256xf32> to vector<16x128xf32>
    %32 = vector.extract_strided_slice %30 {offsets = [0, 128], sizes = [16, 128], strides = [1, 1]} : vector<16x256xf32> to vector<16x128xf32>
    %cst_23 = arith.constant 5.000000e-01 : f32
    %33 = vector.broadcast %cst_23 : f32 to vector<16x128xf32>
    %34 = arith.mulf %33, %32 : vector<16x128xf32>
    %35 = math.exp %34 : vector<16x128xf32>
    %c0_24 = arith.constant 0 : index
    %c0_25 = arith.constant 0 : index
    %36 = vector.load %arg10[%c0_24, %c0_25] : memref<16x128xf32, #tpu.memory_space<vmem>>, vector<16x128xf32>
    %37 = arith.mulf %35, %36 : vector<16x128xf32>
    %38 = arith.addf %31, %37 : vector<16x128xf32>
    %c0_26 = arith.constant 0 : index
    %c0_27 = arith.constant 0 : index
    %39 = vector.load %arg11[%c0_26, %c0_27] : memref<16x128xf32, #tpu.memory_space<vmem>>, vector<16x128xf32>
    tpu.vector_store %arg11[%c0_26, %c0_27], %38 {strides = array<i32>} : memref<16x128xf32, #tpu.memory_space<vmem>>, vector<16x128xf32>,
    return
  }
  func.func @transform_0(%arg0: i32) -> (i32, i32) {
    %c0_i32 = arith.constant 0 : i32
    %c0_i32_0 = arith.constant 0 : i32
    return %arg0, %c0_i32 : i32, i32
  }
  func.func @transform_1(%arg0: i32) -> (i32, i32) {
    %c0_i32 = arith.constant 0 : i32
    %c0_i32_0 = arith.constant 0 : i32
    %c0_i32_1 = arith.constant 0 : i32
    return %c0_i32, %c0_i32_0 : i32, i32
  }
  func.func @transform_2(%arg0: i32) -> (i32, i32) {
    %c0_i32 = arith.constant 0 : i32
    %c0_i32_0 = arith.constant 0 : i32
    %c0_i32_1 = arith.constant 0 : i32
    return %c0_i32, %c0_i32_0 : i32, i32
  }
  func.func @transform_3(%arg0: i32) -> (i32, i32) {
    %c0_i32 = arith.constant 0 : i32
    %c0_i32_0 = arith.constant 0 : i32
    %c0_i32_1 = arith.constant 0 : i32
    return %c0_i32, %c0_i32_0 : i32, i32
  }
  func.func @transform_4(%arg0: i32) -> (i32, i32) {
    %c0_i32 = arith.constant 0 : i32
    %c0_i32_0 = arith.constant 0 : i32
    %c0_i32_1 = arith.constant 0 : i32
    return %c0_i32, %c0_i32_0 : i32, i32
  }
  func.func @transform_5(%arg0: i32) -> (i32, i32) {
    %c0_i32 = arith.constant 0 : i32
    %c0_i32_0 = arith.constant 0 : i32
    %c0_i32_1 = arith.constant 0 : i32
    return %c0_i32, %c0_i32_0 : i32, i32
  }
  func.func @transform_6(%arg0: i32) -> (i32, i32) {
    %c0_i32 = arith.constant 0 : i32
    %c0_i32_0 = arith.constant 0 : i32
    %c0_i32_1 = arith.constant 0 : i32
    return %c0_i32, %c0_i32_0 : i32, i32
  }
  func.func @transform_7(%arg0: i32) -> (i32, i32) {
    %c0_i32 = arith.constant 0 : i32
    %c0_i32_0 = arith.constant 0 : i32
    %c0_i32_1 = arith.constant 0 : i32
    return %c0_i32, %c0_i32_0 : i32, i32
  }
  func.func @transform_8(%arg0: i32) -> (i32, i32) {
    %c0_i32 = arith.constant 0 : i32
    %c0_i32_0 = arith.constant 0 : i32
    %c0_i32_1 = arith.constant 0 : i32
    return %c0_i32, %c0_i32_0 : i32, i32
  }
  func.func @transform_9(%arg0: i32) -> (i32, i32) {
    %c0_i32 = arith.constant 0 : i32
    %c0_i32_0 = arith.constant 0 : i32
    return %arg0, %c0_i32 : i32, i32
  }
  func.func @transform_10(%arg0: i32) -> (i32, i32) {
    %c0_i32 = arith.constant 0 : i32
    %c0_i32_0 = arith.constant 0 : i32
    return %arg0, %c0_i32 : i32, i32
  }
}

</mosaic_0001>

<bundles_post_ra>
// kernel: tpu_custom_call.1
= control target key start
LH: loop header
LB: loop body
LE: loop exit
PB: predicated region body
PF: predicated region fallthrough
CT: control target
= control target key end

     0   :  { %15 = vsyncpa [#allocation3], 0  ;;  %s1958_s0 = inlined_call_operand.hbm [shape: f32[16,128], index: 0, kind: input, shape index: {}]   ;;  %s1959_s1 = inlined_call_operand.hbm [shape: bf16[128,512], index: 1, kind: input, shape index: {}]   ;;  %s1960_s2 = inlined_call_operand.vmem [shape: f32[1,512], index: 2, kind: input, shape index: {}]   ;;  %s1961_s3 = inlined_call_operand.hbm [shape: bf16[512,256], index: 3, kind: input, shape index: {}]   ;;  %s1962_s4 = inlined_call_operand.vmem [shape: f32[1,256], index: 4, kind: input, shape index: {}]   ;;  %s1963_s5 = inlined_call_operand.hbm [shape: bf16[256,128], index: 5, kind: input, shape index: {}]   ;;  %s1964_s6 = inlined_call_operand.vmem [shape: f32[1,128], index: 6, kind: input, shape index: {}]   ;;  %s1965_s7 = inlined_call_operand.hbm [shape: bf16[128,256], index: 7, kind: input, shape index: {}]   ;;  %s1966_s8 = inlined_call_operand.vmem [shape: f32[1,256], index: 8, kind: input, shape index: {}]   ;;  %s1967_s9 = inlined_call_operand.vmem [shape: f32[16,128], index: 9, kind: input, shape index: {}]   ;;  %s1968_s10 = inlined_call_operand.hbm [shape: f32[16,128], index: 10, kind: output, shape index: {}]  }
   0x1   :  { %16 = vsyncpa [#allocation6], 0 }
   0x2   :  { %17 = vsyncpa [#allocation9], 0 }
   0x3   :  { %18 = vsyncpa [#allocation4], 0  ;;  %s1771_s13 = smov [#allocation5]   ;;  %s1631_s17 = scalar_lea.hbm %s1959_s1, 4096 }
   0x4   :  { %s36_s14 = sshll.u32 %s1771_s13, 4  ;;  %p1632_p0 = scmp.ne.s32.totalorder %s1959_s1, %s1631_s17  ;;  %s37_s14 = int_to_ptr.vmem [resolvable:$true] %s36_s14 }
   0x5   :  { %p1635_p1 = scmp.lt.u32.totalorder %s1631_s17, %s1959_s1 }
   0x7   :  { %p1637_p2 = pnand %p1635_p1, %p1632_p0 }
   0x9   :  { %1640 = shalt.err (!%p1637_p2)
}
   0xa   :  { %s1641_s22 = scalar_lea.vmem %s37_s14, 4096  ;;  %p1646_p4 = scmp.lt.s32.totalorder %s37_s14, %s37_s14 }
   0xb   :  { %p1642_p3 = scmp.ne.s32.totalorder %s37_s14, %s1641_s22  ;;  %p1647_p5 = scmp.lt.s32.totalorder %s1641_s22, %s1641_s22 }
   0xd   :  { %p1648_p6 = por %p1647_p5, %p1646_p4 }
   0xf   :  { %p1649_p7 = pnand %p1648_p6, %p1642_p3 }
  0x11   :  { %1652 = shalt.err (!%p1649_p7)
}
  0x12   :  { %s1772_s23 = smov 256   ;;  %s1773_s24 = smov 16  }
  0x13   :  { %42 = dma.hbm_to_vmem [thread:$0]  %s1959_s1, 4096, %s37_s14, [#allocation6], %s1772_s23, %s1772_s23, %s1773_s24  }
  0x14   :  { %s1774_s27 = smov [#allocation8]   ;;  %s1653_s11 = scalar_lea.hbm %s1963_s5, 2048 }
  0x15   :  { %s64_s28 = sshll.u32 %s1774_s27, 4  ;;  %p1654_p8 = scmp.ne.s32.totalorder %s1963_s5, %s1653_s11  ;;  %s65_s28 = int_to_ptr.vmem [resolvable:$true] %s64_s28 }
  0x16   :  { %p1657_p9 = scmp.lt.u32.totalorder %s1653_s11, %s1963_s5 }
  0x18   :  { %p1659_p10 = pnand %p1657_p9, %p1654_p8 }
  0x1a   :  { %1662 = shalt.err (!%p1659_p10)
}
  0x1b   :  { %s1663_s17 = scalar_lea.vmem %s65_s28, 2048  ;;  %p1668_p12 = scmp.lt.s32.totalorder %s65_s28, %s65_s28 }
  0x1c   :  { %p1664_p11 = scmp.ne.s32.totalorder %s65_s28, %s1663_s17  ;;  %p1669_p13 = scmp.lt.s32.totalorder %s1663_s17, %s1663_s17 }
  0x1e   :  { %p1670_p0 = por %p1669_p13, %p1668_p12 }
  0x20   :  { %p1671_p1 = pnand %p1670_p0, %p1664_p11 }
  0x22   :  { %1674 = shalt.err (!%p1671_p1)
}
  0x23   :  { %s1775_s1 = smov 64   ;;  %s1776_s14 = smov 4  }
  0x24   :  { %70 = dma.hbm_to_vmem [thread:$0]  %s1963_s5, 2048, %s65_s28, [#allocation9], %s1775_s1, %s1775_s1, %s1776_s14  }
  0x25   :  { %s1777_s20 = smov [#allocation2]   ;;  %s1675_s24 = scalar_lea.hbm %s1958_s0, 256 }
  0x26   :  { %s24_s21 = sshll.u32 %s1777_s20, 4  ;;  %p1676_p2 = scmp.ne.s32.totalorder %s1958_s0, %s1675_s24  ;;  %s25_s21 = int_to_ptr.vmem [resolvable:$true] %s24_s21 }
  0x27   :  { %p1679_p3 = scmp.lt.u32.totalorder %s1675_s24, %s1958_s0 }
  0x29   :  { %p1681_p4 = pnand %p1679_p3, %p1676_p2 }
  0x2b   :  { %1684 = shalt.err (!%p1681_p4)
}
  0x2c   :  { %s1685_s30 = scalar_lea.vmem %s25_s21, 256  ;;  %p1690_p6 = scmp.lt.s32.totalorder %s25_s21, %s25_s21 }
  0x2d   :  { %p1686_p5 = scmp.ne.s32.totalorder %s25_s21, %s1685_s30  ;;  %p1691_p7 = scmp.lt.s32.totalorder %s1685_s30, %s1685_s30 }
  0x2f   :  { %p1692_p8 = por %p1691_p7, %p1690_p6 }
  0x31   :  { %p1693_p9 = pnand %p1692_p8, %p1686_p5 }
  0x33   :  { %1696 = shalt.err (!%p1693_p9)
}
  0x34   :  { %s1778_s5 = smov 128   ;;  %s1779_s28 = smov 8  }
  0x35   :  { %30 = dma.hbm_to_vmem [thread:$0]  %s1958_s0, 256, %s25_s21, [#allocation3], %s1778_s5, %s1778_s5, %s1779_s28  }
  0x36   :  { %s1780_s13 = smov [#allocation7]   ;;  %s1781_s16 = smov [#allocation10]  }
  0x37   :  { %s50_s15 = sshll.u32 %s1780_s13, 4  ;;  %s78_s17 = sshll.u32 %s1781_s16, 4  ;;  %s51_s15 = int_to_ptr.vmem [resolvable:$true] %s50_s15  ;;  %s79_s17 = int_to_ptr.vmem [resolvable:$true] %s78_s17 }
  0x38   :  { %s1697_s18 = scalar_lea.hbm %s1961_s3, 8192 }
  0x39   :  { %p1698_p10 = scmp.ne.s32.totalorder %s1961_s3, %s1697_s18  ;;  %p1701_p11 = scmp.lt.u32.totalorder %s1697_s18, %s1961_s3 }
  0x3b   :  { %p1703_p12 = pnand %p1701_p11, %p1698_p10 }
  0x3d   :  { %1706 = shalt.err (!%p1703_p12)
}
  0x3e   :  { %s1707_s0 = scalar_lea.vmem %s51_s15, 8192  ;;  %p1712_p0 = scmp.lt.s32.totalorder %s51_s15, %s51_s15 }
  0x3f   :  { %p1708_p13 = scmp.ne.s32.totalorder %s51_s15, %s1707_s0  ;;  %p1713_p1 = scmp.lt.s32.totalorder %s1707_s0, %s1707_s0 }
  0x41   :  { %p1714_p2 = por %p1713_p1, %p1712_p0 }
  0x43   :  { %p1715_p3 = pnand %p1714_p2, %p1708_p13 }
  0x45   :  { %1718 = shalt.err (!%p1715_p3)
}
  0x46   :  { %56 = dma.hbm_to_vmem [thread:$0]  %s1961_s3, 8192, %s51_s15, [#allocation6], %s1778_s5, %s1778_s5, %s1779_s28  }
  0x47   :  { %s1719_s27 = scalar_lea.hbm %s1965_s7, 2048 }
  0x48   :  { %p1720_p4 = scmp.ne.s32.totalorder %s1965_s7, %s1719_s27  ;;  %p1723_p5 = scmp.lt.u32.totalorder %s1719_s27, %s1965_s7 }
  0x4a   :  { %p1725_p6 = pnand %p1723_p5, %p1720_p4 }
  0x4c   :  { %1728 = shalt.err (!%p1725_p6)
}
  0x4d   :  { %s1729_s13 = scalar_lea.vmem %s79_s17, 2048  ;;  %p1734_p8 = scmp.lt.s32.totalorder %s79_s17, %s79_s17 }
  0x4e   :  { %p1730_p7 = scmp.ne.s32.totalorder %s79_s17, %s1729_s13  ;;  %p1735_p9 = scmp.lt.s32.totalorder %s1729_s13, %s1729_s13 }
  0x50   :  { %p1736_p10 = por %p1735_p9, %p1734_p8 }
  0x52   :  { %p1737_p11 = pnand %p1736_p10, %p1730_p7 }
  0x54   :  { %1740 = shalt.err (!%p1737_p11)
}
  0x55   :  { %84 = dma.hbm_to_vmem [thread:$0]  %s1965_s7, 2048, %s79_s17, [#allocation9], %s1778_s5, %s1778_s5, %s1779_s28  }
  0x56   :  { %1763 = dma.done.wait [#allocation3], 256  }
  0x57   :  { %1764 = vsyncadd [#allocation3], 4294967040 }
  0x58   :  { %1765 = dma.done.wait [#allocation6], 12288  }
  0x59   :  { %1766 = vsyncadd [#allocation6], 4294955008 }
  0x5a   :  { %1767 = dma.done.wait [#allocation9], 4096  }
  0x5b   :  { %1768 = vsyncadd [#allocation9], 4294963200  ;;  %v1782_v0 = vmov 0   ;;  %v1443_v1 = vld [vmem:[#allocation5 + $0x4] ss:$16 sps:$4 sm:$0xff]   ;;  %v106_v23 = vld [vmem:[#allocation2 + $0x8] sm:$0xff] }
  0x5c   :  { %354 = vmatprep.mubr.bf16.mxu1 %v1782_v0  ;;  %v1445_v2 = vld [vmem:[#allocation5] ss:$16 sps:$4 sm:$0xff]   ;;  %322 = vmatprep.subr.bf16.mxu1 %v1443_v1  ;;  %v1446_v3 = vld [vmem:[#allocation5 + $0x24] ss:$16 sps:$4 sm:$0xff]   ;;  %v1469_v24 = vld [vmem:[#allocation5 + $0xc] ss:$16 sps:$4 sm:$0xff]  }
  0x5d   :  { %323 = vmatpush1.bf16.msra.mxu1 %v1445_v2  ;;  %v1448_v4 = vld [vmem:[#allocation5 + $0x20] ss:$16 sps:$4 sm:$0xff]   ;;  %v1449_v5 = vld [vmem:[#allocation5 + $0x44] ss:$16 sps:$4 sm:$0xff]   ;;  %v1467_v28 = vld [vmem:[#allocation5 + $0x8] ss:$16 sps:$4 sm:$0xff]  }
  0x5e   :  { %324 = vmatprep.subr.bf16.mxu1 %v1446_v3  ;;  %v1451_v6 = vld [vmem:[#allocation5 + $0x40] ss:$16 sps:$4 sm:$0xff]   ;;  %v1452_v7 = vld [vmem:[#allocation5 + $0x64] ss:$16 sps:$4 sm:$0xff]   ;;  %v1472_v29 = vld [vmem:[#allocation5 + $0x2c] ss:$16 sps:$4 sm:$0xff]  }
  0x5f   :  { %v1454_v8 = vld [vmem:[#allocation5 + $0x60] ss:$16 sps:$4 sm:$0xff]   ;;  %v1455_v9 = vld [vmem:[#allocation5 + $0x84] ss:$16 sps:$4 sm:$0xff]   ;;  %v1470_v32 = vld [vmem:[#allocation5 + $0x28] ss:$16 sps:$4 sm:$0xff]  }
  0x60   :  { %v1457_v10 = vld [vmem:[#allocation5 + $0x80] ss:$16 sps:$4 sm:$0xff]   ;;  %v1458_v11 = vld [vmem:[#allocation5 + $0xa4] ss:$16 sps:$4 sm:$0xff]   ;;  %v1475_v33 = vld [vmem:[#allocation5 + $0x4c] ss:$16 sps:$4 sm:$0xff]  }
  0x61   :  { %325 = vmatpush1.bf16.msra.mxu1 %v1448_v4  ;;  %v1460_v12 = vld [vmem:[#allocation5 + $0xa0] ss:$16 sps:$4 sm:$0xff]   ;;  %v1461_v13 = vld [vmem:[#allocation5 + $0xc4] ss:$16 sps:$4 sm:$0xff]   ;;  %v1473_v36 = vld [vmem:[#allocation5 + $0x48] ss:$16 sps:$4 sm:$0xff]  }
  0x62   :  { %326 = vmatprep.subr.bf16.mxu1 %v1449_v5  ;;  %v1463_v14 = vld [vmem:[#allocation5 + $0xc0] ss:$16 sps:$4 sm:$0xff]   ;;  %v1491_v15 = vld [vmem:[#allocation7 + $0x4] ss:$8 sps:$4 sm:$0xff]   ;;  %v1494_v18 = vld [vmem:[#allocation7 + $0x14] ss:$8 sps:$4 sm:$0xff]  }
  0x63   :  { %v1493_v16 = vld [vmem:[#allocation7] ss:$8 sps:$4 sm:$0xff]   ;;  %v1464_v17 = vld [vmem:[#allocation5 + $0xe4] ss:$16 sps:$4 sm:$0xff]   ;;  %816 = vmatprep.subr.bf16.mxu0 %v1491_v15  ;;  %v1496_v21 = vld [vmem:[#allocation7 + $0x10] ss:$8 sps:$4 sm:$0xff]  }
  0x64   :  { %v1466_v19 = vld [vmem:[#allocation5 + $0xe0] ss:$16 sps:$4 sm:$0xff]   ;;  %817 = vmatpush1.bf16.msra.mxu0 %v1493_v16  ;;  %v1497_v22 = vld [vmem:[#allocation7 + $0x24] ss:$8 sps:$4 sm:$0xff]   ;;  %v1500_v27 = vld [vmem:[#allocation7 + $0x34] ss:$8 sps:$4 sm:$0xff]  }
  0x65   :  { %327 = vmatpush1.bf16.msra.mxu1 %v1451_v6  ;;  %v105_v20 = vld [vmem:[#allocation2] sm:$0xff]  ;;  %818 = vmatprep.subr.bf16.mxu0 %v1494_v18  ;;  %v1499_v25 = vld [vmem:[#allocation7 + $0x20] ss:$8 sps:$4 sm:$0xff]   ;;  %v1503_v31 = vld [vmem:[#allocation7 + $0x44] ss:$8 sps:$4 sm:$0xff]   ;;  %s1783_s22 = smov [#allocation11]  }
  0x66   :  { %328 = vmatprep.subr.bf16.mxu1 %v1452_v7  ;;  %v1909_v26 = vpack.c.bf16 %v106_v23, %v105_v20  ;;  %v1502_v30 = vld [vmem:[#allocation7 + $0x30] ss:$8 sps:$4 sm:$0xff]   ;;  %v1505_v34 = vld [vmem:[#allocation7 + $0x40] ss:$8 sps:$4 sm:$0xff]   ;;  %v1506_v35 = vld [vmem:[#allocation7 + $0x54] ss:$8 sps:$4 sm:$0xff]  }
  0x67   :  { %v1478_v37 = vld [vmem:[#allocation5 + $0x6c] ss:$16 sps:$4 sm:$0xff]   ;;  %v1508_v38 = vld [vmem:[#allocation7 + $0x50] ss:$8 sps:$4 sm:$0xff]   ;;  %v1511_v42 = vld [vmem:[#allocation7 + $0x60] ss:$8 sps:$4 sm:$0xff]  }
  0x68   :  { %819 = vmatpush1.bf16.msra.mxu0 %v1496_v21  ;;  %v1509_v39 = vld [vmem:[#allocation7 + $0x64] ss:$8 sps:$4 sm:$0xff]   ;;  %v1476_v40 = vld [vmem:[#allocation5 + $0x68] ss:$16 sps:$4 sm:$0xff]   ;;  %v1512_v43 = vld [vmem:[#allocation7 + $0x74] ss:$8 sps:$4 sm:$0xff]  }
  0x69   :  { %329 = vmatpush1.bf16.msra.mxu1 %v1454_v8  ;;  %820 = vmatprep.subr.bf16.mxu0 %v1497_v22  ;;  %v1481_v41 = vld [vmem:[#allocation5 + $0x8c] ss:$16 sps:$4 sm:$0xff]   ;;  %v1479_v44 = vld [vmem:[#allocation5 + $0x88] ss:$16 sps:$4 sm:$0xff]   ;;  %v1587_v6 = vld [vmem:[#allocation8 + $0x40] sm:$0xff]   ;;  %s1257_s23 = sshll.u32 %s1783_s22, 4  ;;  %s1258_s23 = int_to_ptr.vmem [resolvable:$true] %s1257_s23 }
  0x6a   :  { %330 = vmatprep.subr.bf16.mxu1 %v1455_v9  ;;  %v1484_v45 = vld [vmem:[#allocation5 + $0xac] ss:$16 sps:$4 sm:$0xff]   ;;  %v1514_v46 = vld [vmem:[#allocation7 + $0x70] ss:$8 sps:$4 sm:$0xff]   ;;  %v1517_v50 = vld [vmem:[#allocation7 + $0x80] ss:$8 sps:$4 sm:$0xff]   ;;  %p1746_p13 = scmp.lt.s32.totalorder %s1258_s23, %s1258_s23 }
  0x6b   :  { %v1515_v47 = vld [vmem:[#allocation7 + $0x84] ss:$8 sps:$4 sm:$0xff]   ;;  %v1482_v48 = vld [vmem:[#allocation5 + $0xa8] ss:$16 sps:$4 sm:$0xff]   ;;  %v1518_v51 = vld [vmem:[#allocation7 + $0x94] ss:$8 sps:$4 sm:$0xff]  }
  0x6c   :  { %821 = vmatpush1.bf16.msra.mxu0 %v1499_v25  ;;  %v1487_v49 = vld [vmem:[#allocation5 + $0xcc] ss:$16 sps:$4 sm:$0xff]   ;;  %v1485_v52 = vld [vmem:[#allocation5 + $0xc8] ss:$16 sps:$4 sm:$0xff]   ;;  %v1588_v7 = vld [vmem:[#allocation8] sm:$0xff]   ;;  %s1741_s0 = scalar_lea.vmem %s1258_s23, 256 }
  0x6d   :  { %331 = vmatpush1.bf16.msra.mxu1 %v1457_v10  ;;  %822 = vmatprep.subr.bf16.mxu0 %v1500_v27  ;;  %v1490_v53 = vld [vmem:[#allocation5 + $0xec] ss:$16 sps:$4 sm:$0xff]   ;;  %v1520_v54 = vld [vmem:[#allocation7 + $0x90] ss:$8 sps:$4 sm:$0xff]   ;;  %v1523_v57 = vld [vmem:[#allocation7 + $0xa0] ss:$8 sps:$4 sm:$0xff]   ;;  %p1742_p12 = scmp.ne.s32.totalorder %s1258_s23, %s1741_s0  ;;  %p1747_p0 = scmp.lt.s32.totalorder %s1741_s0, %s1741_s0 }
  0x6e   :  { %332 = vmatprep.subr.bf16.mxu1 %v1458_v11  ;;  %v1521_v55 = vld [vmem:[#allocation7 + $0xa4] ss:$8 sps:$4 sm:$0xff]   ;;  %v1488_v56 = vld [vmem:[#allocation5 + $0xe8] ss:$16 sps:$4 sm:$0xff]   ;;  %v1524_v58 = vld [vmem:[#allocation7 + $0xb4] ss:$8 sps:$4 sm:$0xff]  }
  0x6f   :  { %v1526_v59 = vld [vmem:[#allocation7 + $0xb0] ss:$8 sps:$4 sm:$0xff]   ;;  %v1527_v60 = vld [vmem:[#allocation7 + $0xc4] ss:$8 sps:$4 sm:$0xff]   ;;  %v1529_v61 = vld [vmem:[#allocation7 + $0xc0] ss:$8 sps:$4 sm:$0xff]   ;;  %p1748_p1 = por %p1747_p0, %p1746_p13 }
  0x70   :  { %823 = vmatpush1.bf16.msra.mxu0 %v1502_v30  ;;  %v1530_v62 = vld [vmem:[#allocation7 + $0xd4] ss:$8 sps:$4 sm:$0xff]   ;;  %v1532_v63 = vld [vmem:[#allocation7 + $0xd0] ss:$8 sps:$4 sm:$0xff]   ;;  %v1533_v1 = vld [vmem:[#allocation7 + $0xe4] ss:$8 sps:$4 sm:$0xff]  }
  0x71   :  { %333 = vmatpush1.bf16.msra.mxu1 %v1460_v12  ;;  %824 = vmatprep.subr.bf16.mxu0 %v1503_v31  ;;  %v1535_v2 = vld [vmem:[#allocation7 + $0xe0] ss:$8 sps:$4 sm:$0xff]   ;;  %v1536_v3 = vld [vmem:[#allocation7 + $0xf4] ss:$8 sps:$4 sm:$0xff]   ;;  %v1538_v4 = vld [vmem:[#allocation7 + $0xf0] ss:$8 sps:$4 sm:$0xff]   ;;  %p1749_p2 = pnand %p1748_p1, %p1742_p12 }
  0x72   :  { %334 = vmatprep.subr.bf16.mxu1 %v1461_v13  ;;  %v1541_v5 = vld [vmem:[#allocation7 + $0x104] ss:$8 sps:$4 sm:$0xff]   ;;  %v1591_v10 = vld [vmem:[#allocation8 + $0x50] sm:$0xff]   ;;  %v1593_v12 = vld [vmem:[#allocation8 + $0x58] sm:$0xff]  }
  0x73   :  { %v1589_v8 = vld [vmem:[#allocation8 + $0x48] sm:$0xff]   ;;  %v1592_v11 = vld [vmem:[#allocation8 + $0x10] sm:$0xff]   ;;  %v1594_v13 = vld [vmem:[#allocation8 + $0x18] sm:$0xff]  }
  0x74   :  { %825 = vmatpush1.bf16.msra.mxu0 %v1505_v34  ;;  %v1590_v9 = vld [vmem:[#allocation8 + $0x8] sm:$0xff]   ;;  %v1596_v15 = vld [vmem:[#allocation8 + $0x20] sm:$0xff]   ;;  %v140_v20 = vld [vmem:[%s1960_s2] sm:$0xf] }
  0x75   :  { %335 = vmatpush1.bf16.msra.mxu1 %v1463_v14  ;;  %826 = vmatprep.subr.bf16.mxu0 %v1506_v35  ;;  %v1595_v14 = vld [vmem:[#allocation8 + $0x60] sm:$0xff]   ;;  %v1597_v16 = vld [vmem:[#allocation8 + $0x68] sm:$0xff]  }
  0x76   :  { %336 = vmatprep.subr.bf16.mxu1 %v1464_v17  ;;  %v142_v17 = vlaneseq }
  0x78   :  { %827 = vmatpush1.bf16.msra.mxu0 %v1508_v38  ;;  %v143_v18 = vshrl.u32 %v142_v17, 7  ;;  %v1539_v38 = vld [vmem:[#allocation7 + $0x100] ss:$8 sps:$4 sm:$0xff]  }
  0x79   :  { %337 = vmatpush1.bf16.msra.mxu1 %v1466_v19  ;;  %828 = vmatprep.subr.bf16.mxu0 %v1509_v39  ;;  %v1544_v39 = vld [vmem:[#allocation7 + $0x114] ss:$8 sps:$4 sm:$0xff]   ;;  %v1575_v17 = vld [vmem:[#allocation7 + $0x1c0] ss:$8 sps:$4 sm:$0xff]  }
  0x7a   :  { %365 = vmatprep.subr.bf16.mxu1 %v1469_v24  ;;  %v1914_v19 = vsub.s32 0, %v143_v18  ;;  %v1919_v21 = vsub.s32 1, %v143_v18 }
  0x7c   :  { %355 = vmatmul.mubr.bf16.vlgmr.msra.gmra.mrb[0].mxu1 %v1909_v26  ;;  %829 = vmatpush1.bf16.msra.mxu0 %v1511_v42  ;;  %v145_v22 = vrot.slane %v140_v20, %v1914_v19  ;;  %v149_v23 = vrot.slane %v140_v20, %v1919_v21  ;;  %v1545_v42 = vld [vmem:[#allocation7 + $0x120] ss:$8 sps:$4 sm:$0xff]  }
  0x7d   :  { %366 = vmatpush1.bf16.msra.mxu1 %v1467_v28  ;;  %397 = vmatprep.mubr.bf16.mxu1 %v1782_v0 }
  0x7e   :  { %367 = vmatprep.subr.bf16.mxu1 %v1472_v29  ;;  %830 = vmatprep.subr.bf16.mxu0 %v1512_v43  ;;  %v1550_v43 = vld [vmem:[#allocation7 + $0x134] ss:$8 sps:$4 sm:$0xff]  }
  0x80   :  { %831 = vmatpush1.bf16.msra.mxu0 %v1514_v46  ;;  %v1551_v46 = vld [vmem:[#allocation7 + $0x140] ss:$8 sps:$4 sm:$0xff]  }
  0x81   :  { %368 = vmatpush1.bf16.msra.mxu1 %v1470_v32  ;;  %832 = vmatprep.subr.bf16.mxu0 %v1515_v47  ;;  %v1556_v47 = vld [vmem:[#allocation7 + $0x154] ss:$8 sps:$4 sm:$0xff]  }
  0x82   :  { %369 = vmatprep.subr.bf16.mxu1 %v1475_v33 }
  0x84   :  { %833 = vmatpush1.bf16.msra.mxu0 %v1517_v50  ;;  %v1554_v50 = vld [vmem:[#allocation7 + $0x150] ss:$8 sps:$4 sm:$0xff]  }
  0x85   :  { %370 = vmatpush1.bf16.msra.mxu1 %v1473_v36  ;;  %834 = vmatprep.subr.bf16.mxu0 %v1518_v51  ;;  %v1559_v51 = vld [vmem:[#allocation7 + $0x164] ss:$8 sps:$4 sm:$0xff]  }
  0x86   :  { %371 = vmatprep.subr.bf16.mxu1 %v1478_v37 }
  0x88   :  { %835 = vmatpush1.bf16.msra.mxu0 %v1520_v54  ;;  %v1557_v54 = vld [vmem:[#allocation7 + $0x160] ss:$8 sps:$4 sm:$0xff]  }
  0x89   :  { %372 = vmatpush1.bf16.msra.mxu1 %v1476_v40  ;;  %836 = vmatprep.subr.bf16.mxu0 %v1521_v55  ;;  %v1542_v40 = vld [vmem:[#allocation7 + $0x110] ss:$8 sps:$4 sm:$0xff]  }
  0x8a   :  { %373 = vmatprep.subr.bf16.mxu1 %v1481_v41  ;;  %v1547_v41 = vld [vmem:[#allocation7 + $0x124] ss:$8 sps:$4 sm:$0xff]  }
  0x8c   :  { %837 = vmatpush1.bf16.msra.mxu0 %v1523_v57 }
  0x8d   :  { %374 = vmatpush1.bf16.msra.mxu1 %v1479_v44  ;;  %838 = vmatprep.subr.bf16.mxu0 %v1524_v58  ;;  %v1548_v44 = vld [vmem:[#allocation7 + $0x130] ss:$8 sps:$4 sm:$0xff]  }
  0x8e   :  { %375 = vmatprep.subr.bf16.mxu1 %v1484_v45  ;;  %v1553_v45 = vld [vmem:[#allocation7 + $0x144] ss:$8 sps:$4 sm:$0xff]  }
  0x90   :  { %839 = vmatpush1.bf16.msra.mxu0 %v1526_v59 }
  0x91   :  { %376 = vmatpush1.bf16.msra.mxu1 %v1482_v48  ;;  %840 = vmatprep.subr.bf16.mxu0 %v1527_v60  ;;  %v152_v48 = vsub.s32 2, %v143_v18 }
  0x92   :  { %377 = vmatprep.subr.bf16.mxu1 %v1487_v49  ;;  %v156_v49 = vsub.s32 3, %v143_v18  ;;  %v1580_v18 = vld [vmem:[#allocation7 + $0x1d4] ss:$8 sps:$4 sm:$0xff]  }
  0x94   :  { %841 = vmatpush1.bf16.msra.mxu0 %v1529_v61 }
  0x95   :  { %378 = vmatpush1.bf16.msra.mxu1 %v1485_v52  ;;  %842 = vmatprep.subr.bf16.mxu0 %v1530_v62  ;;  %v153_v52 = vrot.slane %v140_v20, %v152_v48 }
  0x96   :  { %379 = vmatprep.subr.bf16.mxu1 %v1490_v53  ;;  %v157_v53 = vrot.slane %v140_v20, %v156_v49  ;;  %v1578_v20 = vld [vmem:[#allocation7 + $0x1d0] ss:$8 sps:$4 sm:$0xff]   ;;  %v1603_v49 = vld [vmem:[#allocation10] ss:$8 sps:$4 sm:$0xff]  }
  0x98   :  { %843 = vmatpush1.bf16.msra.mxu0 %v1532_v63 }
  0x99   :  { %380 = vmatpush1.bf16.msra.mxu1 %v1488_v56  ;;  %844 = vmatprep.subr.bf16.mxu0 %v1533_v1  ;;  %v1562_v56 = vld [vmem:[#allocation7 + $0x174] ss:$8 sps:$4 sm:$0xff]   ;;  %v1560_v1 = vld [vmem:[#allocation7 + $0x170] ss:$8 sps:$4 sm:$0xff]  }
  0x9a   :  { %1400 = vmatprep.subr.bf16.mxu1 %v1587_v6 }
  0x9c   :  { %398 = vmatmul.mubr.bf16.vlgmr.msra.gmra.mrb[4].mxu1 %v1909_v26  ;;  %845 = vmatpush1.bf16.msra.mxu0 %v1535_v2 }
  0x9d   :  { %846 = vmatprep.subr.bf16.mxu0 %v1536_v3  ;;  %1401 = vmatpush3.bf16.msra.mxu1 %v1588_v7 }
  0x9e   :  { %1402 = vmatprep.subr.bf16.mxu1 %v1589_v8  ;;  %v1563_v8 = vld [vmem:[#allocation7 + $0x180] ss:$8 sps:$4 sm:$0xff]  }
  0xa0   :  { %847 = vmatpush1.bf16.msra.mxu0 %v1538_v4  ;;  %v1565_v4 = vld [vmem:[#allocation7 + $0x184] ss:$8 sps:$4 sm:$0xff]  }
  0xa1   :  { %859 = vmatprep.subr.bf16.mxu0 %v1541_v5  ;;  %1403 = vmatpush3.bf16.msra.mxu1 %v1590_v9 }
  0xa2   :  { %1404 = vmatprep.subr.bf16.mxu1 %v1591_v10  ;;  %v1568_v10 = vld [vmem:[#allocation7 + $0x194] ss:$8 sps:$4 sm:$0xff]  }
  0xa5   :  { %1405 = vmatpush3.bf16.msra.mxu1 %v1592_v11  ;;  %v1566_v11 = vld [vmem:[#allocation7 + $0x190] ss:$8 sps:$4 sm:$0xff]  }
  0xa6   :  { %1406 = vmatprep.subr.bf16.mxu1 %v1593_v12  ;;  %v1571_v12 = vld [vmem:[#allocation7 + $0x1a4] ss:$8 sps:$4 sm:$0xff]  }
  0xa9   :  { %1407 = vmatpush3.bf16.msra.mxu1 %v1594_v13  ;;  %v1569_v13 = vld [vmem:[#allocation7 + $0x1a0] ss:$8 sps:$4 sm:$0xff]  }
  0xaa   :  { %1408 = vmatprep.subr.bf16.mxu1 %v1595_v14  ;;  %v1574_v14 = vld [vmem:[#allocation7 + $0x1b4] ss:$8 sps:$4 sm:$0xff]  }
  0xad   :  { %1409 = vmatpush3.bf16.msra.mxu1 %v1596_v15  ;;  %v1572_v15 = vld [vmem:[#allocation7 + $0x1b0] ss:$8 sps:$4 sm:$0xff]  }
  0xae   :  { %1410 = vmatprep.subr.bf16.mxu1 %v1597_v16  ;;  %v1577_v16 = vld [vmem:[#allocation7 + $0x1c4] ss:$8 sps:$4 sm:$0xff]  }
 0x14f   :  { %v356_v24 = vpop.f32.mrb[0].mxu1 }
 0x150   :  { %v357_v25 = vadd.f32 %v356_v24, %v145_v22  ;;  %v358_v26 = vpop.f32.mrb[1].mxu1  ;;  %v1586_v24 = vld [vmem:[#allocation7 + $0x1f4] ss:$8 sps:$4 sm:$0xff]  }
 0x151   :  { %v359_v27 = vadd.f32 %v358_v26, %v149_v23  ;;  %v360_v28 = vpop.f32.mrb[2].mxu1  ;;  %v1598_v26 = vld [vmem:[#allocation8 + $0x28] sm:$0xff]  }
 0x152   :  { %v361_v29 = vadd.f32 %v360_v28, %v145_v22  ;;  %v362_v30 = vpop.f32.mrb[3].mxu1  ;;  %v408_v32 = vmax.f32 %v357_v25, 0.0  ;;  %v1583_v22 = vld [vmem:[#allocation7 + $0x1e4] ss:$8 sps:$4 sm:$0xff]   ;;  %v1584_v25 = vld [vmem:[#allocation7 + $0x1f0] ss:$8 sps:$4 sm:$0xff]   ;;  %1411 = vmatpush3.bf16.msra.mxu1 %v1598_v26 }
 0x153   :  { %v363_v31 = vadd.f32 %v362_v30, %v149_v23  ;;  %v409_v34 = vmax.f32 %v359_v27, 0.0  ;;  %v1581_v23 = vld [vmem:[#allocation7 + $0x1e0] ss:$8 sps:$4 sm:$0xff]   ;;  %v1599_v27 = vld [vmem:[#allocation8 + $0x70] sm:$0xff]   ;;  %v1602_v30 = vld [vmem:[#allocation8 + $0x38] sm:$0xff]  }
 0x154   :  { %v412_v33 = vmax.f32 %v361_v29, 0.0  ;;  %v1600_v28 = vld [vmem:[#allocation8 + $0x30] sm:$0xff]   ;;  %1412 = vmatprep.subr.bf16.mxu1 %v1599_v27  ;;  %v1601_v29 = vld [vmem:[#allocation8 + $0x78] sm:$0xff]  }
 0x155   :  { %v413_v35 = vmax.f32 %v363_v31, 0.0  ;;  %v1605_v31 = vld [vmem:[#allocation10 + $0x4] ss:$8 sps:$4 sm:$0xff]   ;;  %v1244_v27 = vld [vmem:[%s1967_s9] sm:$0xff] }
 0x156   :  { %v416_v36 = vpack.c.bf16 %v412_v33, %v408_v32  ;;  %1413 = vmatpush3.bf16.msra.mxu1 %v1600_v28  ;;  %v484_v32 = vld [vmem:[%s1962_s4] sm:$0x3] }
 0x157   :  { %v417_v37 = vpack.c.bf16 %v413_v35, %v409_v34  ;;  %1414 = vmatprep.subr.bf16.mxu1 %v1601_v29  ;;  %v489_v33 = vrot.slane %v484_v32, %v1914_v19  ;;  %v493_v34 = vrot.slane %v484_v32, %v1919_v21 }
 0x159   :  { %848 = vmatprep.mubr.bf16.mxu0 %v417_v37 }
 0x15a   :  { %849 = vmatmul.mubr.bf16.vlgmr.msra.gmra.mrb[0].mxu0 %v416_v36  ;;  %1415 = vmatpush3.bf16.msra.mxu1 %v1602_v30 }
 0x15b   :  { %860 = vmatpush1.bf16.msra.mxu0 %v1539_v38  ;;  %1195 = vmatprep.subr.bf16.mxu1 %v1605_v31 }
 0x15c   :  { %861 = vmatprep.subr.bf16.mxu0 %v1544_v39 }
 0x15f   :  { %862 = vmatpush1.bf16.msra.mxu0 %v1542_v40 }
 0x160   :  { %863 = vmatprep.subr.bf16.mxu0 %v1547_v41 }
 0x163   :  { %864 = vmatpush1.bf16.msra.mxu0 %v1545_v42 }
 0x164   :  { %865 = vmatprep.subr.bf16.mxu0 %v1550_v43 }
 0x167   :  { %866 = vmatpush1.bf16.msra.mxu0 %v1548_v44 }
 0x168   :  { %867 = vmatprep.subr.bf16.mxu0 %v1553_v45 }
 0x16b   :  { %868 = vmatpush1.bf16.msra.mxu0 %v1551_v46 }
 0x16c   :  { %869 = vmatprep.subr.bf16.mxu0 %v1556_v47 }
 0x16f   :  { %870 = vmatpush1.bf16.msra.mxu0 %v1554_v50  ;;  %v399_v55 = vpop.f32.mrb[4].mxu1  ;;  %v1608_v50 = vld [vmem:[#allocation10 + $0x14] ss:$8 sps:$4 sm:$0xff]  }
 0x170   :  { %871 = vmatprep.subr.bf16.mxu0 %v1559_v51  ;;  %v400_v57 = vadd.f32 %v399_v55, %v153_v52  ;;  %v401_v58 = vpop.f32.mrb[5].mxu1  ;;  %v1606_v51 = vld [vmem:[#allocation10 + $0x10] ss:$8 sps:$4 sm:$0xff]  }
 0x171   :  { %v402_v59 = vadd.f32 %v401_v58, %v157_v53  ;;  %v403_v60 = vpop.f32.mrb[6].mxu1  ;;  %v1612_v55 = vld [vmem:[#allocation10 + $0x30] ss:$8 sps:$4 sm:$0xff]   ;;  %v1620_v58 = vld [vmem:[#allocation10 + $0x54] ss:$8 sps:$4 sm:$0xff]  }
 0x172   :  { %v410_v61 = vmax.f32 %v400_v57, 0.0  ;;  %v404_v62 = vadd.f32 %v403_v60, %v153_v52  ;;  %v405_v63 = vpop.f32.mrb[7].mxu1  ;;  %v1611_v52 = vld [vmem:[#allocation10 + $0x24] ss:$8 sps:$4 sm:$0xff]   ;;  %v1615_v57 = vld [vmem:[#allocation10 + $0x40] ss:$8 sps:$4 sm:$0xff]  }
 0x173   :  { %872 = vmatpush1.bf16.msra.mxu0 %v1557_v54  ;;  %v411_v2 = vmax.f32 %v402_v59, 0.0  ;;  %v406_v3 = vadd.f32 %v405_v63, %v157_v53  ;;  %v1609_v53 = vld [vmem:[#allocation10 + $0x20] ss:$8 sps:$4 sm:$0xff]   ;;  %v1614_v54 = vld [vmem:[#allocation10 + $0x34] ss:$8 sps:$4 sm:$0xff]  }
 0x174   :  { %873 = vmatprep.subr.bf16.mxu0 %v1562_v56  ;;  %v414_v5 = vmax.f32 %v404_v62, 0.0  ;;  %v1617_v56 = vld [vmem:[#allocation10 + $0x44] ss:$8 sps:$4 sm:$0xff]   ;;  %v1618_v59 = vld [vmem:[#allocation10 + $0x50] ss:$8 sps:$4 sm:$0xff]  }
 0x175   :  { %v415_v6 = vmax.f32 %v406_v3, 0.0  ;;  %v1623_v60 = vld [vmem:[#allocation10 + $0x64] ss:$8 sps:$4 sm:$0xff]   ;;  %v1624_v62 = vld [vmem:[#allocation10 + $0x70] ss:$8 sps:$4 sm:$0xff]  }
 0x176   :  { %v418_v7 = vpack.c.bf16 %v414_v5, %v410_v61  ;;  %v1626_v61 = vld [vmem:[#allocation10 + $0x74] ss:$8 sps:$4 sm:$0xff]  }
 0x177   :  { %874 = vmatpush1.bf16.msra.mxu0 %v1560_v1  ;;  %v419_v9 = vpack.c.bf16 %v415_v6, %v411_v2  ;;  %v1367_v1 = vld [vmem:[%s1964_s6] ss:$0 sm:$0xff] }
 0x178   :  { %875 = vmatprep.subr.bf16.mxu0 %v1565_v4 }
 0x179   :  { %891 = vmatprep.mubr.bf16.mxu0 %v419_v9 }
 0x17b   :  { %876 = vmatpush1.bf16.msra.mxu0 %v1563_v8 }
 0x17c   :  { %877 = vmatprep.subr.bf16.mxu0 %v1568_v10 }
 0x17f   :  { %878 = vmatpush1.bf16.msra.mxu0 %v1566_v11 }
 0x180   :  { %879 = vmatprep.subr.bf16.mxu0 %v1571_v12  ;;  %v1103_v12 = vld [vmem:[%s1966_s8] sm:$0x3] }
 0x181   :  { %v1108_v26 = vrot.slane %v1103_v12, %v1914_v19 }
 0x183   :  { %880 = vmatpush1.bf16.msra.mxu0 %v1569_v13  ;;  %v1112_v13 = vrot.slane %v1103_v12, %v1919_v21  ;;  %v1245_v21 = vld [vmem:[%s1967_s9 + $0x8] sm:$0xff] }
 0x184   :  { %881 = vmatprep.subr.bf16.mxu0 %v1574_v14 }
 0x187   :  { %882 = vmatpush1.bf16.msra.mxu0 %v1572_v15 }
 0x188   :  { %883 = vmatprep.subr.bf16.mxu0 %v1577_v16 }
 0x18b   :  { %884 = vmatpush1.bf16.msra.mxu0 %v1575_v17 }
 0x18c   :  { %885 = vmatprep.subr.bf16.mxu0 %v1580_v18 }
 0x18f   :  { %886 = vmatpush1.bf16.msra.mxu0 %v1578_v20 }
 0x190   :  { %887 = vmatprep.subr.bf16.mxu0 %v1583_v22 }
 0x193   :  { %888 = vmatpush1.bf16.msra.mxu0 %v1581_v23 }
 0x194   :  { %889 = vmatprep.subr.bf16.mxu0 %v1586_v24 }
 0x197   :  { %890 = vmatpush1.bf16.msra.mxu0 %v1584_v25 }
 0x19a   :  { %892 = vmatmul.mubr.bf16.vlgmr.msra.gmra.mrb[0].mxu0 %v418_v7 }
 0x26d   :  { %v893_v35 = vpop.f32.mrb[0].mxu0 }
 0x26e   :  { %v1422_v36 = vadd.f32 %v893_v35, %v489_v33  ;;  %v895_v37 = vpop.f32.mrb[1].mxu0 }
 0x26f   :  { %v1423_v38 = vadd.f32 %v895_v37, %v493_v34  ;;  %v897_v39 = vpop.f32.mrb[2].mxu0 }
 0x270   :  { %v1424_v40 = vadd.f32 %v897_v39, %v489_v33  ;;  %v899_v41 = vpop.f32.mrb[3].mxu0  ;;  %v902_v43 = vmax.f32 %v1422_v36, 0.0 }
 0x271   :  { %v1425_v42 = vadd.f32 %v899_v41, %v493_v34  ;;  %v903_v45 = vmax.f32 %v1423_v38, 0.0 }
 0x272   :  { %v904_v44 = vmax.f32 %v1424_v40, 0.0 }
 0x273   :  { %v905_v46 = vmax.f32 %v1425_v42, 0.0 }
 0x274   :  { %v906_v47 = vpack.c.bf16 %v904_v44, %v902_v43 }
 0x275   :  { %v907_v48 = vpack.c.bf16 %v905_v46, %v903_v45 }
 0x277   :  { %1075 = vmatprep.mubr.bf16.mxu1 %v907_v48 }
 0x278   :  { %1076 = vmatmul.mubr.bf16.vlgmr.msra.gmra.mrb[8].mxu1 %v906_v47 }
 0x279   :  { %1196 = vmatpush1.bf16.msra.mxu1 %v1603_v49  ;;  %1227 = vmatprep.mubr.bf16.mxu1 %v1782_v0  ;;  %v1621_v0 = vld [vmem:[#allocation10 + $0x60] ss:$8 sps:$4 sm:$0xff]  }
 0x27a   :  { %1197 = vmatprep.subr.bf16.mxu1 %v1608_v50 }
 0x27d   :  { %1198 = vmatpush1.bf16.msra.mxu1 %v1606_v51 }
 0x27e   :  { %1199 = vmatprep.subr.bf16.mxu1 %v1611_v52 }
 0x281   :  { %1200 = vmatpush1.bf16.msra.mxu1 %v1609_v53 }
 0x282   :  { %1201 = vmatprep.subr.bf16.mxu1 %v1614_v54 }
 0x285   :  { %1202 = vmatpush1.bf16.msra.mxu1 %v1612_v55 }
 0x286   :  { %1203 = vmatprep.subr.bf16.mxu1 %v1617_v56 }
 0x289   :  { %1204 = vmatpush1.bf16.msra.mxu1 %v1615_v57 }
 0x28a   :  { %1205 = vmatprep.subr.bf16.mxu1 %v1620_v58 }
 0x28d   :  { %1206 = vmatpush1.bf16.msra.mxu1 %v1618_v59 }
 0x28e   :  { %1207 = vmatprep.subr.bf16.mxu1 %v1623_v60 }
 0x291   :  { %1208 = vmatpush1.bf16.msra.mxu1 %v1621_v0 }
 0x292   :  { %1209 = vmatprep.subr.bf16.mxu1 %v1626_v61 }
 0x295   :  { %1210 = vmatpush1.bf16.msra.mxu1 %v1624_v62 }
 0x34b   :  { %v1416_v63 = vpop.f32.mrb[8].mxu1 }
 0x34c   :  { %v1417_v2 = vpop.f32.mrb[9].mxu1 }
 0x34d   :  { %v1418_v3 = vadd.f32 %v1417_v2, %v1416_v63  ;;  %v1419_v4 = vpop.f32.mrb[10].mxu1 }
 0x34e   :  { %v1420_v5 = vpop.f32.mrb[11].mxu1 }
 0x34f   :  { %v1078_v6 = vadd.f32 %v1418_v3, %v1367_v1  ;;  %v1421_v7 = vadd.f32 %v1420_v5, %v1419_v4 }
 0x351   :  { %v1081_v8 = vadd.f32 %v1421_v7, %v1367_v1  ;;  %v1084_v9 = vmax.f32 %v1078_v6, 0.0 }
 0x353   :  { %v1085_v10 = vmax.f32 %v1081_v8, 0.0 }
 0x355   :  { %v1086_v11 = vpack.c.bf16 %v1085_v10, %v1084_v9 }
 0x357   :  { %1228 = vmatmul.mubr.bf16.vlgmr.msra.gmra.mrb[12].mxu1 %v1086_v11 }
 0x42a   :  { %v1229_v14 = vpop.f32.mrb[12].mxu1 }
 0x42b   :  { %v1231_v15 = vpop.f32.mrb[13].mxu1  ;;  %v1230_v29 = vadd.f32 %v1229_v14, %v1108_v26 }
 0x42c   :  { %v1232_v16 = vadd.f32 %v1231_v15, %v1112_v13  ;;  %v1233_v17 = vpop.f32.mrb[14].mxu1 }
 0x42d   :  { %v1235_v18 = vpop.f32.mrb[15].mxu1  ;;  %v1234_v32 = vadd.f32 %v1233_v17, %v1108_v26 }
 0x42e   :  { %v1238_v20 = vmul.f32 0.5, %v1232_v16  ;;  %v1236_v22 = vadd.f32 %v1235_v18, %v1112_v13 }
 0x430   :  { %v1240_v23 = vmul.f32 1.442695, %v1238_v20  ;;  %v1239_v24 = vmul.f32 0.5, %v1236_v22 }
 0x432   :  { %1627 = vpow2.f32 %v1240_v23  ;;  %v1242_v25 = vmul.f32 1.442695, %v1239_v24 }
 0x434   :  { %1629 = vpow2.f32 %v1242_v25 }
 0x43c   :  { %v1628_v28 = vpop.eup %1627 }
 0x43d   :  { %v1246_v30 = vmul.f32 %v1628_v28, %v1244_v27 }
 0x43e   :  { %v1630_v31 = vpop.eup %1629 }
 0x43f   :  { %v1247_v33 = vmul.f32 %v1630_v31, %v1245_v21  ;;  %v1248_v34 = vadd.f32 %v1246_v30, %v1230_v29 }
 0x441   :  { %v1249_v35 = vadd.f32 %v1247_v33, %v1234_v32  ;;  %1250 = vst [vmem:[#allocation11] sm:$0xff] %v1248_v34 }
 0x443   :  { %1251 = vst [vmem:[#allocation11 + $0x8] sm:$0xff] %v1249_v35 }
 0x444   :  { %1752 = shalt.err (!%p1749_p2)
}
 0x445   :  { %s1753_s24 = scalar_lea.hbm %s1968_s10, 256 }
 0x446   :  { %p1754_p3 = scmp.ne.s32.totalorder %s1968_s10, %s1753_s24  ;;  %p1757_p4 = scmp.lt.u32.totalorder %s1753_s24, %s1968_s10 }
 0x448   :  { %p1759_p5 = pnand %p1757_p4, %p1754_p3 }
 0x44a   :  { %1762 = shalt.err (!%p1759_p5)
}
 0x44b   :  { %1263 = dma.vmem_to_hbm [thread:$0]  %s1258_s23, 256, %s1968_s10, [#allocation4], %s1778_s5, %s1778_s5, %s1779_s28  }
 0x44c   :  { %1769 = dma.done.wait [#allocation4], 256  }
 0x44d   :  { %1770 = vsyncadd [#allocation4], 4294967040 }
 0x44e   :  { %1267 = vsyncpa [#allocation3], 1 }
 0x44f   :  { %1268 = vsyncpa [#allocation6], 1 }
 0x450   :  { %1269 = vsyncpa [#allocation9], 1 }
 0x451   :  { %1270 = vsyncpa [#allocation4], 1 }

</bundles_post_ra>
